<compile_context>
chip_gen: v6e
topology: v6e:2x2x1
jax: 0.10.0
libtpu: 0.0.40
codegen_flags: <defaults>
</compile_context>

<pallas_src>
import functools

import jax
import jax.numpy as jnp
import numpy as np
from jax.experimental import pallas as pl
from jax.experimental.pallas import tpu as pltpu


def _round_up(a: int, b: int) -> int:
    return (a + b - 1) // b * b


@functools.lru_cache(maxsize=64)
def _build_resize_plan(l_in: int, l_out: int, block_n: int, chunk_cap: int = 256):
    """Host-side (numpy, float64) plan for align_corners=False linear resize.

    Returns:
      idx   (2, n_pad) int32  : [i0; i1] absolute source indices (edge-replicated padding)
      wts   (2, n_pad) float32: [w0; w1] lerp weights (w0 + w1 == 1)
      kb    (n_tiles,) int32  : per-output-tile K-window start, in chunk_k-block units
      chunk_k, kw, l_in_pad   : K-chunk width, chunks per window, padded source length
    """
    n_pad = _round_up(l_out, block_n)
    n_tiles = n_pad // block_n

    j = np.arange(l_out, dtype=np.float64)
    scale = l_in / l_out
    coord = np.maximum((j + 0.5) * scale - 0.5, 0.0)        # PyTorch clamps negative coords
    i0 = np.clip(np.floor(coord), 0, l_in - 1).astype(np.int64)
    i1 = np.minimum(i0 + 1, l_in - 1)
    w1 = coord - i0
    w0 = 1.0 - w1

    # Edge-replicate the lane-padding columns: they stay inside the last tile's K window,
    # their weights still sum to 1, and the wrapper slices those output columns away.
    pad = n_pad - l_out
    i0 = np.pad(i0, (0, pad), mode="edge")
    i1 = np.pad(i1, (0, pad), mode="edge")
    w0 = np.pad(w0, (0, pad), mode="edge")
    w1 = np.pad(w1, (0, pad), mode="edge")

    idx = np.stack([i0, i1]).astype(np.int32)               # (2, n_pad)
    wts = np.stack([w0, w1]).astype(np.float32)             # (2, n_pad)

    lo = i0.reshape(n_tiles, block_n).min(axis=1)           # first source index per tile
    hi = i1.reshape(n_tiles, block_n).max(axis=1)           # last source index per tile
    span = int((hi - lo).max()) + 1

    if l_in <= chunk_cap or span + chunk_cap >= l_in:
        # Windowing buys nothing: contract over the full source length in one chunk.
        chunk_k, kw, l_in_pad = l_in, 1, l_in
        kb = np.zeros((n_tiles,), np.int32)
    else:
        chunk_k = chunk_cap                                  # multiple of 128 (lane tile)
        l_in_pad = _round_up(l_in, chunk_k)
        num_kb = l_in_pad // chunk_k
        kb_lo = lo // chunk_k
        kb_hi = hi // chunk_k
        kw = int((kb_hi - kb_lo).max()) + 1                  # chunks per window (static)
        # Clamp so kb + kw never runs past the padded source; clamping down only enlarges
        # coverage on the low side, so every tile's [lo, hi] stays inside its window.
        kb = np.minimum(kb_lo, num_kb - kw).astype(np.int32)

    return idx, wts, kb, chunk_k, kw, l_in_pad


def _resize_kernel(kb_ref, x_ref, idx_ref, wts_ref, o_ref, acc_ref):
    """One (block_c, block_n) output tile, accumulated over kw K-chunks.

    kb_ref  : (n_tiles,) int32 SMEM  per-output-tile K-window start (chunk units)
    x_ref   : (block_c, chunk_k)     source chunk  (window chunk kj of tile ni)
    idx_ref : (2, block_n) int32     [i0; i1] absolute source indices for this tile
    wts_ref : (2, block_n) f32       [w0; w1] lerp weights (always f32)
    o_ref   : (block_c, block_n)     output tile (lane-dense, 128-multiple wide)
    acc_ref : (block_c, block_n) f32 accumulator scratch (persists across kj)
    """
    ni = pl.program_id(1)
    kj = pl.program_id(2)
    nk = pl.num_programs(2)
    chunk_k = x_ref.shape[-1]
    block_n = o_ref.shape[-1]

    @pl.when(kj == 0)
    def _():
        acc_ref[...] = jnp.zeros_like(acc_ref)

    # Window-relative 2-tap indices for this K-chunk.
    base = (kb_ref[ni] + kj) * chunk_k                       # scalar (SMEM)
    rel = idx_ref[...] - base                                # (2, block_n) int32
    wts = wts_ref[...]                                       # (2, block_n) f32

    # Synthesize the 2-non-zero interpolation tile on the VPU — only chunk_k rows now.
    # Taps whose source index falls outside this chunk simply never match (their
    # contribution is added by the chunk that does contain them); when i1 clamps to i0
    # at the right edge, the two terms sum to w0 + w1 = 1 (PyTorch edge replication).
    rows = jax.lax.broadcasted_iota(jnp.int32, (chunk_k, block_n), 0)
    w_tile = (jnp.where(rows == rel[0:1, :], wts[0:1, :], 0.0)
              + jnp.where(rows == rel[1:2, :], wts[1:2, :], 0.0))  # (chunk_k, block_n) f32

    x = x_ref[...]
    if x.dtype == jnp.bfloat16:
        # bf16 fast path: native MXU dtype; ~2^-9 relative weight rounding is fine here.
        acc_ref[...] += jnp.dot(x, w_tile.astype(jnp.bfloat16),
                                preferred_element_type=jnp.float32)
    else:
        acc_ref[...] += jnp.dot(x.astype(jnp.float32), w_tile,
                                preferred_element_type=jnp.float32,
                                precision=jax.lax.Precision.HIGHEST)

    @pl.when(kj == nk - 1)
    def _():
        o_ref[...] = acc_ref[...].astype(o_ref.dtype)


def _reference_resize_linear(x: jax.Array, size: int) -> jax.Array:
    """Pure-JAX reference; coordinates in float64 (matches PyTorch / the kernel tables)."""
    c, l_in = x.shape
    j = np.arange(size, dtype=np.float64)
    coord = np.maximum((j + 0.5) * (l_in / size) - 0.5, 0.0)
    i0 = np.clip(np.floor(coord), 0, l_in - 1).astype(np.int64)
    i1 = np.minimum(i0 + 1, l_in - 1)
    w1 = jnp.asarray((coord - i0).astype(np.float32))
    w0 = jnp.asarray((1.0 - (coord - i0)).astype(np.float32))
    x0 = x[:, i0].astype(jnp.float32)
    x1 = x[:, i1].astype(jnp.float32)
    return (x0 * w0[None, :] + x1 * w1[None, :]).astype(x.dtype)


def resize_linear(x: jax.Array, size: int, *, block_n: int = 128,
                  max_block_c: int = 256, force_pallas: bool = True) -> jax.Array:
    """Equivalent of Resize(size, 'linear').forward(x) for x of shape (C, L_in)."""
    c, l_in = x.shape

    if not force_pallas and c * size < (1 << 14):
        # Tiny problems: pallas_call launch + DMA overhead dwarfs the useful work.
        return _reference_resize_linear(x, size)

    idx_np, wts_np, kb_np, chunk_k, kw, l_in_pad = _build_resize_plan(l_in, size, block_n)
    n_pad = idx_np.shape[1]
    n_tiles = n_pad // block_n

    # Channels: no host-side pad — Pallas masks the partial trailing channel block.
    block_c = min(_round_up(c, 8), _round_up(max_block_c, 8))
    c_tiles = pl.cdiv(c, block_c)

    # Zero-pad the length axis only when the K-window path needs whole aligned chunks
    # (padded entries are multiplied by exactly-zero weights, so they contribute 0.0;
    # never rely on unspecified out-of-bounds reads feeding the dot).
    x_p = x if l_in_pad == l_in else jnp.pad(x, ((0, 0), (0, l_in_pad - l_in)))

    idx = jnp.asarray(idx_np)
    wts = jnp.asarray(wts_np)
    kb = jnp.asarray(kb_np)

    itemsize = jnp.dtype(x.dtype).itemsize
    cost = pl.CostEstimate(
        flops=int(2 * c * kw * chunk_k * n_pad),
        transcendentals=0,
        bytes_accessed=int((c * l_in + c * size) * itemsize
                           + idx.nbytes + wts.nbytes + kb.nbytes),
    )

    out = pl.pallas_call(
        _resize_kernel,
        out_shape=jax.ShapeDtypeStruct((c, n_pad), x.dtype),
        grid_spec=pltpu.PrefetchScalarGridSpec(
            num_scalar_prefetch=1,                      # kb window table -> SMEM
            grid=(c_tiles, n_tiles, kw),                # reduction (kw) axis last
            in_specs=[
                # x chunk: data-dependent K window via the prefetched block-offset table.
                pl.BlockSpec((block_c, chunk_k),
                             lambda ci, ni, kj, ks: (ci, ks[ni] + kj)),
                # Per-output-tile 2-tap tables; block index constant across kj, so the
                # tiny DMAs happen once per (ci, ni), not per grid step.
                pl.BlockSpec((2, block_n), lambda ci, ni, kj, ks: (0, ni)),
                pl.BlockSpec((2, block_n), lambda ci, ni, kj, ks: (0, ni)),
            ],
            out_specs=pl.BlockSpec((block_c, block_n),
                                   lambda ci, ni, kj, ks: (ci, ni)),
            scratch_shapes=[pltpu.VMEM((block_c, block_n), jnp.float32)],
        ),
        compiler_params=pltpu.CompilerParams(
            dimension_semantics=("parallel", "parallel", "arbitrary"),
        ),
        cost_estimate=cost,
    )(kb, x_p, idx, wts)

    # Only lane padding may exist; slice columns only (rows already exact).
    return out if n_pad == size else out[:, :size]


class Resize:
    """Drop-in analogue of the PyTorch module (forward on (C, L_in) arrays)."""

    def __init__(self, size, interpolation="linear"):
        if interpolation != "linear":
            # TODO(synk): only 'linear' (the module's default) is implemented in Pallas.
            raise NotImplementedError("only 'linear' interpolation is implemented")
        self.size = size
        self.mode = interpolation

    def __call__(self, x):
        return resize_linear(x, self.size)

    forward = __call__


if __name__ == "__main__":
    key = jax.random.PRNGKey(0)
    k0, k1, k2 = jax.random.split(key, 3)

    # Case 1: module-scale demo — Resize(size=32, 'linear') on (C=4, L_in=16).
    x1 = jax.random.normal(k0, (4, 16), dtype=jnp.float32)
    out1 = jax.block_until_ready(Resize(32)(x1))
    ref1 = _reference_resize_linear(x1, 32)
    assert out1.shape == (4, 32), out1.shape
    assert jnp.allclose(out1, ref1, atol=1e-5, rtol=1e-5), "mismatch vs reference (case 1)"

    # Case 2: partial channel block (12 % 8 != 0), lane padding (200 -> 256), 2 output tiles.
    x2 = jax.random.normal(k1, (12, 96), dtype=jnp.float32)
    out2 = jax.block_until_ready(resize_linear(x2, 200))
    ref2 = _reference_resize_linear(x2, 200)
    assert out2.shape == (12, 200), out2.shape
    assert jnp.allclose(out2, ref2, atol=1e-5, rtol=1e-5), "mismatch vs reference (case 2)"

    # Case 3: exercises the K-windowed path (downsample 2048 -> 384; kw > 1 accumulation,
    # data-dependent x BlockSpec indices from the scalar-prefetched window table).
    x3 = jax.random.normal(k2, (16, 2048), dtype=jnp.float32)
    out3 = jax.block_until_ready(resize_linear(x3, 384))
    ref3 = _reference_resize_linear(x3, 384)
    assert out3.shape == (16, 384), out3.shape
    assert jnp.allclose(out3, ref3, atol=1e-5, rtol=1e-5), "mismatch vs reference (case 3)"

    print("KERNEL_OK")
</pallas_src>

<mosaic_0001>
module attributes {stable_mosaic.version = 11 : i64} {
  func.func @_resize_kernel(%arg0: i32, %arg1: i32, %arg2: i32, %arg3: memref<1xi32, #tpu.memory_space<smem>>, %arg4: memref<8x16xf32, #tpu.memory_space<vmem>>, %arg5: memref<2x128xi32, #tpu.memory_space<vmem>>, %arg6: memref<2x128xf32, #tpu.memory_space<vmem>>, %arg7: memref<8x128xf32, #tpu.memory_space<vmem>>, %arg8: memref<8x128xf32, #tpu.memory_space<vmem>>) attributes {dimension_semantics = [#tpu.dimension_semantics<parallel>, #tpu.dimension_semantics<parallel>, #tpu.dimension_semantics<arbitrary>], iteration_bounds = array<i64: 1, 1, 1>, scalar_prefetch = 1 : i64, scratch_operands = 1 : i64, tpu.core_type = #tpu.core_type<tc>, window_params = [{transform_indices = @transform_0, window_bounds = array<i64: 8, 16>}, {transform_indices = @transform_1, window_bounds = array<i64: 2, 128>}, {transform_indices = @transform_2, window_bounds = array<i64: 2, 128>}, {transform_indices = @transform_3, window_bounds = array<i64: 8, 128>}]} {
    %c0_i32 = arith.constant 0 : i32
    %0 = arith.cmpi eq, %arg2, %c0_i32 : i32
    %1 = arith.extui %0 : i1 to i32
    %c0_i32_0 = arith.constant 0 : i32
    %2 = arith.cmpi ne, %1, %c0_i32_0 : i32
    scf.if %2 {
      %cst_14 = arith.constant 0.000000e+00 : f32
      %37 = vector.broadcast %cst_14 : f32 to vector<8x128xf32>
      %c0_15 = arith.constant 0 : index
      %c0_16 = arith.constant 0 : index
      %38 = vector.load %arg8[%c0_15, %c0_16] : memref<8x128xf32, #tpu.memory_space<vmem>>, vector<8x128xf32>
      tpu.vector_store %arg8[%c0_15, %c0_16], %37 {strides = array<i32>} : memref<8x128xf32, #tpu.memory_space<vmem>>, vector<8x128xf32>,
    } else {
    }
    %3 = arith.index_cast %arg1 : i32 to index
    %4 = memref.load %arg3[%3] : memref<1xi32, #tpu.memory_space<smem>>
    %5 = arith.addi %4, %arg2 : i32
    %c16_i32 = arith.constant 16 : i32
    %6 = arith.muli %5, %c16_i32 : i32
    %c0 = arith.constant 0 : index
    %c0_1 = arith.constant 0 : index
    %7 = vector.load %arg5[%c0, %c0_1] : memref<2x128xi32, #tpu.memory_space<vmem>>, vector<2x128xi32>
    %8 = vector.broadcast %6 : i32 to vector<2x128xi32>
    %9 = arith.subi %7, %8 : vector<2x128xi32>
    %c0_2 = arith.constant 0 : index
    %c0_3 = arith.constant 0 : index
    %10 = vector.load %arg6[%c0_2, %c0_3] : memref<2x128xf32, #tpu.memory_space<vmem>>, vector<2x128xf32>
    %11 = tpu.iota {dimensions = array<i32: 0>} : vector<16x128xi32>
    %12 = vector.extract_strided_slice %9 {offsets = [0, 0], sizes = [1, 128], strides = [1, 1]} : vector<2x128xi32> to vector<1x128xi32>
    %13 = vector.broadcast %12 : vector<1x128xi32> to vector<16x128xi32>
    %14 = arith.cmpi eq, %11, %13 : vector<16x128xi32>
    %15 = vector.extract_strided_slice %10 {offsets = [0, 0], sizes = [1, 128], strides = [1, 1]} : vector<2x128xf32> to vector<1x128xf32>
    %cst = arith.constant 0.000000e+00 : f32
    %16 = vector.shape_cast %15 : vector<1x128xf32> to vector<1x128xf32>
    %17 = vector.broadcast %16 : vector<1x128xf32> to vector<16x128xf32>
    %18 = vector.broadcast %cst : f32 to vector<16x128xf32>
    %19 = arith.select %14, %17, %18 : vector<16x128xi1>, vector<16x128xf32>
    %20 = vector.extract_strided_slice %9 {offsets = [1, 0], sizes = [1, 128], strides = [1, 1]} : vector<2x128xi32> to vector<1x128xi32>
    %21 = vector.broadcast %20 : vector<1x128xi32> to vector<16x128xi32>
    %22 = arith.cmpi eq, %11, %21 : vector<16x128xi32>
    %23 = vector.extract_strided_slice %10 {offsets = [1, 0], sizes = [1, 128], strides = [1, 1]} : vector<2x128xf32> to vector<1x128xf32>
    %cst_4 = arith.constant 0.000000e+00 : f32
    %24 = vector.shape_cast %23 : vector<1x128xf32> to vector<1x128xf32>
    %25 = vector.broadcast %24 : vector<1x128xf32> to vector<16x128xf32>
    %26 = vector.broadcast %cst_4 : f32 to vector<16x128xf32>
    %27 = arith.select %22, %25, %26 : vector<16x128xi1>, vector<16x128xf32>
    %28 = arith.addf %19, %27 : vector<16x128xf32>
    %c0_5 = arith.constant 0 : index
    %c0_6 = arith.constant 0 : index
    %29 = vector.load %arg4[%c0_5, %c0_6] : memref<8x16xf32, #tpu.memory_space<vmem>>, vector<8x16xf32>
    %c0_7 = arith.constant 0 : index
    %c0_8 = arith.constant 0 : index
    %30 = vector.load %arg8[%c0_7, %c0_8] : memref<8x128xf32, #tpu.memory_space<vmem>>, vector<8x128xf32>
    %cst_9 = arith.constant dense<0.000000e+00> : vector<8x128xf32>
    %31 = tpu.matmul %29, %28, %cst_9 {dimension_numbers = #tpu.dot_dimension_numbers<[1], [0], [0], [1], [0, 0, 1, 1], [], []>, precision = #tpu.contract_precision<fp32>} : vector<8x16xf32>, vector<16x128xf32>, vector<8x128xf32> -> vector<8x128xf32>
    %32 = arith.addf %30, %31 : vector<8x128xf32>
    %c0_10 = arith.constant 0 : index
    %c0_11 = arith.constant 0 : index
    %33 = vector.load %arg8[%c0_10, %c0_11] : memref<8x128xf32, #tpu.memory_space<vmem>>, vector<8x128xf32>
    tpu.vector_store %arg8[%c0_10, %c0_11], %32 {strides = array<i32>} : memref<8x128xf32, #tpu.memory_space<vmem>>, vector<8x128xf32>,
    %c0_i32_12 = arith.constant 0 : i32
    %34 = arith.cmpi eq, %arg2, %c0_i32_12 : i32
    %35 = arith.extui %34 : i1 to i32
    %c0_i32_13 = arith.constant 0 : i32
    %36 = arith.cmpi ne, %35, %c0_i32_13 : i32
    scf.if %36 {
      %c0_14 = arith.constant 0 : index
      %c0_15 = arith.constant 0 : index
      %37 = vector.load %arg8[%c0_14, %c0_15] : memref<8x128xf32, #tpu.memory_space<vmem>>, vector<8x128xf32>
      %c0_16 = arith.constant 0 : index
      %c0_17 = arith.constant 0 : index
      %38 = vector.load %arg7[%c0_16, %c0_17] : memref<8x128xf32, #tpu.memory_space<vmem>>, vector<8x128xf32>
      tpu.vector_store %arg7[%c0_16, %c0_17], %37 {strides = array<i32>} : memref<8x128xf32, #tpu.memory_space<vmem>>, vector<8x128xf32>,
    } else {
    }
    return
  }
  func.func @transform_0(%arg0: i32, %arg1: i32, %arg2: i32, %arg3: memref<1xi32, #tpu.memory_space<smem>>) -> (i32, i32) {
    %0 = arith.index_cast %arg1 : i32 to index
    %1 = memref.load %arg3[%0] : memref<1xi32, #tpu.memory_space<smem>>
    %2 = arith.addi %1, %arg2 : i32
    %c0_i32 = arith.constant 0 : i32
    return %arg0, %2 : i32, i32
  }
  func.func @transform_1(%arg0: i32, %arg1: i32, %arg2: i32, %arg3: memref<1xi32, #tpu.memory_space<smem>>) -> (i32, i32) {
    %c0_i32 = arith.constant 0 : i32
    %c0_i32_0 = arith.constant 0 : i32
    return %c0_i32, %arg1 : i32, i32
  }
  func.func @transform_2(%arg0: i32, %arg1: i32, %arg2: i32, %arg3: memref<1xi32, #tpu.memory_space<smem>>) -> (i32, i32) {
    %c0_i32 = arith.constant 0 : i32
    %c0_i32_0 = arith.constant 0 : i32
    return %c0_i32, %arg1 : i32, i32
  }
  func.func @transform_3(%arg0: i32, %arg1: i32, %arg2: i32, %arg3: memref<1xi32, #tpu.memory_space<smem>>) -> (i32, i32) {
    %c0_i32 = arith.constant 0 : i32
    return %arg0, %arg1 : i32, i32
  }
}

</mosaic_0001>

<bundles_post_ra>
// kernel: tpu_custom_call.1
= control target key start
LH: loop header
LB: loop body
LE: loop exit
PB: predicated region body
PF: predicated region fallthrough
CT: control target
= control target key end

     0   :  { %10 = vsyncpa [#allocation6], 0  ;;  %s768_s0 = inlined_call_operand.<no memory space> [shape: s32[1], index: 0, kind: input, shape index: {}]   ;;  %s769_s1 = inlined_call_operand.hbm [shape: f32[4,16], index: 1, kind: input, shape index: {}]   ;;  %s770_s2 = inlined_call_operand.vmem [shape: s32[2,128], index: 2, kind: input, shape index: {}]   ;;  %s771_s3 = inlined_call_operand.vmem [shape: f32[2,128], index: 3, kind: input, shape index: {}]   ;;  %s772_s4 = inlined_call_operand.hbm [shape: f32[4,128], index: 4, kind: output, shape index: {}]  }
   0x1   :  { %11 = vsyncpa [#allocation7], 0 }
   0x2   :  { %18 = vsyncadd [#allocation6], 64  ;;  %s569_s17 = sshll.u32 %s768_s0, 6  ;;  %s683_s21 = smov [#allocation5]  }
   0x3   :  { %s20_s20 = scalar_lea.hbm %s769_s1, %s569_s17  ;;  %s21_s22 = sshll.u32 %s683_s21, 4  ;;  %s22_s22 = int_to_ptr.vmem [resolvable:$true] %s21_s22 }
   0x4   :  { %s637_s23 = scalar_lea.hbm %s20_s20, 64  ;;  %s639_s26 = scalar_lea.hbm %s769_s1, 64 }
   0x5   :  { %p638_p0 = scmp.ne.s32.totalorder %s20_s20, %s637_s23  ;;  %p640_p1 = scmp.lt.s32.totalorder %s20_s20, %s769_s1 }
   0x6   :  { %p641_p2 = scmp.lt.s32.totalorder %s639_s26, %s637_s23 }
   0x8   :  { %p642_p3 = por %p641_p2, %p640_p1 }
   0xa   :  { %p643_p4 = pnand %p642_p3, %p638_p0 }
   0xc   :  { %646 = shalt.err (!%p643_p4)
}
   0xd   :  { %s647_s29 = scalar_lea.vmem %s22_s22, 64  ;;  %s651_s30 = scalar_lea.vmem %s22_s22, 128 }
   0xe   :  { %p648_p5 = scmp.ne.s32.totalorder %s22_s22, %s647_s29  ;;  %p652_p6 = scmp.lt.s32.totalorder %s22_s22, %s22_s22 }
   0xf   :  { %p653_p7 = scmp.lt.s32.totalorder %s651_s30, %s647_s29 }
  0x11   :  { %p654_p8 = por %p653_p7, %p652_p6 }
  0x13   :  { %p655_p9 = pnand %p654_p8, %p648_p5 }
  0x15   :  { %658 = shalt.err (!%p655_p9)
}
  0x16   :  { %s684_s5 = smov 64   ;;  %s685_s6 = smov 4  }
  0x17   :  { %27 = dma.hbm_to_vmem [thread:$0]  %s20_s20, 64, %s22_s22, [#allocation6], %s684_s5, %s684_s5, %s685_s6  }
  0x18   :  { %679 = dma.done.wait [#allocation6], 128  }
  0x19   :  { %680 = vsyncadd [#allocation6], 4294967168  ;;  %v49_v0 = vlaneseq  ;;  %v686_v1 = vmov 0.0   ;;  %vm687_vm0 = vmmov 0   ;;  %s570_s8 = sshll.u32 %s768_s0, 4  ;;  %vm80_vm1 = vcmask 130048  }
  0x1a   :  { %589 = vmatprep.subr.mxu0 %v686_v1  ;;  %593 = vmatprep.mubr.msk.f32.mxu0 %vm687_vm0, %v686_v1  ;;  %v46_v3 = vstv %s570_s8  ;;  %v45_v6 = vld [vmem:[%s770_s2] sm:$0x3] }
  0x1b   :  { %v50_v2 = vshrl.u32 %v49_v0, 7  ;;  %596 = vmatprep.subr.mxu1 %v686_v1  ;;  %600 = vmatprep.mubr.msk.f32.mxu1 %vm687_vm0, %v686_v1  ;;  %v48_v7 = vld [vmem:[%s771_s3] sm:$0x3]  ;;  %v47_v9 = vsub.s32 %v45_v6, %v46_v3 }
  0x1c   :  { %v78_v8 = vld [vmem:[#allocation5] sm:$0xff] }
  0x1d   :  { %v54_v4 = vsub.s32 0, %v50_v2  ;;  %v66_v5 = vsub.s32 1, %v50_v2  ;;  %v51_v10 = vadd.s32 8, %v50_v2  ;;  %v82_v11 = vsel %vm80_vm1, %v78_v8, 0 }
  0x1e   :  { %v151_v14 = vand.u32 4294901760, %v82_v11 }
  0x1f   :  { %v61_v12 = vrot.slane %v48_v7, %v54_v4  ;;  %v73_v13 = vrot.slane %v48_v7, %v66_v5  ;;  %v55_v15 = vrot.slane %v47_v9, %v54_v4  ;;  %v67_v16 = vrot.slane %v47_v9, %v66_v5 }
  0x20   :  { %v152_v17 = vsub.f32 %v82_v11, %v151_v14 }
  0x21   :  { %vm57_vm2 = vcmp.eq.s32.totalorder %v51_v10, %v55_v15  ;;  %vm69_vm3 = vcmp.eq.s32.totalorder %v51_v10, %v67_v16  ;;  %vm56_vm4 = vcmp.eq.s32.totalorder %v50_v2, %v55_v15  ;;  %vm68_vm5 = vcmp.eq.s32.totalorder %v50_v2, %v67_v16 }
  0x22   :  { %v63_v18 = vsel %vm57_vm2, %v61_v12, 0.0  ;;  %v75_v19 = vsel %vm69_vm3, %v73_v13, 0.0  ;;  %v62_v20 = vsel %vm56_vm4, %v61_v12, 0.0  ;;  %v74_v21 = vsel %vm68_vm5, %v73_v13, 0.0 }
  0x23   :  { %v77_v22 = vadd.f32 %v75_v19, %v63_v18  ;;  %v76_v23 = vadd.f32 %v74_v21, %v62_v20  ;;  %v153_v24 = vand.u32 4294901760, %v152_v17 }
  0x25   :  { %v113_v25 = vand.u32 4294901760, %v77_v22  ;;  %v116_v26 = vand.u32 4294901760, %v76_v23  ;;  %v154_v27 = vsub.f32 %v152_v17, %v153_v24 }
  0x27   :  { %590 = vmatpush3.msra.mxu0 %v113_v25  ;;  %v155_v28 = vand.u32 4294901760, %v154_v27  ;;  %v191_v29 = vsub.f32 %v77_v22, %v113_v25  ;;  %v198_v30 = vsub.f32 %v76_v23, %v116_v26 }
  0x28   :  { %591 = vmatprep.subr.mxu0 %v686_v1 }
  0x29   :  { %592 = vmatpush3.msra.mxu0 %v116_v26  ;;  %v192_v31 = vand.u32 4294901760, %v191_v29  ;;  %v199_v32 = vand.u32 4294901760, %v198_v30 }
  0x2a   :  { %594 = vmatmul.mubr.f32.vlgmr.msra.gmra.mxu0 %v155_v28  ;;  %603 = vmatprep.subr.mxu0 %v686_v1 }
  0x2b   :  { %v193_v33 = vsub.f32 %v191_v29, %v192_v31  ;;  %604 = vmatpush3.msra.mxu0 %v191_v29  ;;  %v200_v34 = vsub.f32 %v198_v30, %v199_v32  ;;  %607 = vmatprep.mubr.msk.f32.mxu0 %vm687_vm0, %v686_v1 }
  0x2c   :  { %605 = vmatprep.subr.mxu0 %v686_v1 }
  0x2d   :  { %v194_v35 = vand.u32 4294901760, %v193_v33  ;;  %v201_v36 = vand.u32 4294901760, %v200_v34  ;;  %606 = vmatpush3.msra.mxu0 %v198_v30 }
  0x2e   :  { %608 = vmatmul.mubr.f32.vlgmr.msra.gmra.mxu0 %v152_v17  ;;  %617 = vmatprep.subr.mxu0 %v686_v1 }
  0x2f   :  { %597 = vmatpush3.msra.mxu1 %v194_v35  ;;  %618 = vmatpush3.msra.mxu0 %v192_v31 }
  0x30   :  { %598 = vmatprep.subr.mxu1 %v686_v1  ;;  %619 = vmatprep.subr.mxu0 %v686_v1 }
  0x31   :  { %599 = vmatpush3.msra.mxu1 %v201_v36  ;;  %620 = vmatpush3.msra.mxu0 %v199_v32 }
  0x32   :  { %601 = vmatmul.mubr.f32.vlgmr.msra.gmra.mxu1 %v151_v14  ;;  %610 = vmatprep.subr.mxu1 %v686_v1 }
  0x33   :  { %611 = vmatpush3.msra.mxu1 %v113_v25  ;;  %614 = vmatprep.mubr.msk.f32.mxu1 %vm687_vm0, %v686_v1 }
  0x34   :  { %612 = vmatprep.subr.mxu1 %v686_v1  ;;  %621 = vmatprep.mubr.msk.f32.mxu0 %vm687_vm0, %v686_v1 }
  0x35   :  { %613 = vmatpush3.msra.mxu1 %v116_v26  ;;  %622 = vmatmul.mubr.f32.vlgmr.msra.gmra.mxu0 %v151_v14 }
  0x36   :  { %615 = vmatmul.mubr.f32.vlgmr.msra.gmra.mxu1 %v153_v24  ;;  %624 = vmatprep.subr.mxu1 %v686_v1 }
  0x37   :  { %625 = vmatpush3.msra.mxu1 %v113_v25  ;;  %628 = vmatprep.mubr.msk.f32.mxu1 %vm687_vm0, %v686_v1 }
  0x38   :  { %626 = vmatprep.subr.mxu1 %v686_v1 }
  0x39   :  { %627 = vmatpush3.msra.mxu1 %v116_v26 }
  0x3a   :  { %629 = vmatmul.mubr.f32.vlgmr.msra.gmra.mxu1 %v151_v14 }
  0xea   :  { %v157_v37 = vpop.f32.mrf.mxu0 }
  0xec   :  { %v595_v38 = vpop.f32.mrf.mxu0 }
  0xee   :  { %v314_v39 = vpop.f32.mrf.mxu0 }
  0xf0   :  { %v609_v40 = vpop.f32.mrf.mxu0 }
  0xf2   :  { %v238_v41 = vpop.f32.mrf.mxu1 }
  0xf3   :  { %v239_v42 = vadd.f32 %v238_v41, %v157_v37 }
  0xf4   :  { %v602_v43 = vpop.f32.mrf.mxu1 }
  0xf5   :  { %v315_v44 = vadd.f32 %v314_v39, %v239_v42  ;;  %v466_v45 = vpop.f32.mrf.mxu0 }
  0xf6   :  { %v389_v46 = vpop.f32.mrf.mxu1 }
  0xf7   :  { %v390_v47 = vadd.f32 %v389_v46, %v315_v44  ;;  %v623_v48 = vpop.f32.mrf.mxu0 }
  0xf8   :  { %v616_v49 = vpop.f32.mrf.mxu1 }
  0xf9   :  { %v467_v50 = vadd.f32 %v466_v45, %v390_v47 }
  0xfa   :  { %v539_v51 = vpop.f32.mrf.mxu1 }
  0xfb   :  { %v540_v52 = vadd.f32 %v539_v51, %v467_v50 }
  0xfc   :  { %v630_v53 = vpop.f32.mrf.mxu1 }
  0xfd   :  { %549 = vst [vmem:[#allocation8] sm:$0xff] %v540_v52 }
  0xfe   :  { %554 = vsyncadd [#allocation7], 64  ;;  %s688_s0 = smov [#allocation8]  }
  0xff   :  { %s555_s2 = sshll.u32 %s688_s0, 4  ;;  %s556_s2 = int_to_ptr.vmem [resolvable:$true] %s555_s2 }
 0x100   :  { %s659_s3 = scalar_lea.vmem %s556_s2, 64  ;;  %s663_s13 = scalar_lea.vmem %s556_s2, 128 }
 0x101   :  { %p660_p10 = scmp.ne.s32.totalorder %s556_s2, %s659_s3  ;;  %p664_p11 = scmp.lt.s32.totalorder %s556_s2, %s556_s2 }
 0x102   :  { %p665_p12 = scmp.lt.s32.totalorder %s663_s13, %s659_s3 }
 0x104   :  { %p666_p13 = por %p665_p12, %p664_p11 }
 0x106   :  { %p667_p0 = pnand %p666_p13, %p660_p10 }
 0x108   :  { %670 = shalt.err (!%p667_p0)
}
 0x109   :  { %561 = dma.vmem_to_hbm [thread:$0]  %s556_s2, 64, %s772_s4, [#allocation7], %s684_s5, %s684_s5, %s685_s6  }
 0x10a   :  { %681 = dma.done.wait [#allocation7], 128  }
 0x10b   :  { %682 = vsyncadd [#allocation7], 4294967168 }
 0x10c   :  { %565 = vsyncpa [#allocation6], 1 }
 0x10d   :  { %566 = vsyncpa [#allocation7], 1 }

</bundles_post_ra>
